<compile_context>
chip_gen: v7x
topology: tpu7x:2x2x1
jax: 0.10.0
libtpu: 0.0.40
codegen_flags: <defaults>
</compile_context>

<pallas_src>
import functools

import jax
import jax.numpy as jnp
from jax.experimental import pallas as pl
from jax.experimental.pallas import tpu as pltpu


def _softplus(x):
    # Stable log(1 + exp(x)); matches torch.nn.functional.softplus defaults.
    return jnp.logaddexp(x, 0.0)


def _round_up(n, m):
    return ((n + m - 1) // m) * m


def encoder_kernel(xT_ref, w1_ref, b1_ref, w2_ref, b2_ref,
                   wmu_ref, bmu_ref, wlv_ref, blv_ref,
                   loc_ref, scale_ref):
    # Feature-major: every value is [features, batch_tile]; batch rides the 128 lanes.
    xT = xT_ref[...]                                                      # [S, tb] f32

    # fc1 + softplus
    h = _softplus(jnp.dot(w1_ref[...], xT,
                          preferred_element_type=jnp.float32) + b1_ref[...])   # [H, tb]

    # fc2 + softplus
    h = _softplus(jnp.dot(w2_ref[...], h,
                          preferred_element_type=jnp.float32) + b2_ref[...])   # [H, tb]

    # dropout -> identity (eval mode)

    # Separate mu / logvar heads: each half only pays its own activation.
    zmu = jnp.dot(wmu_ref[...], h, preferred_element_type=jnp.float32) + bmu_ref[...]
    zlv = jnp.dot(wlv_ref[...], h, preferred_element_type=jnp.float32) + blv_ref[...]

    loc_ref[...] = _softplus(zmu)                                         # [K, tb]
    scale_ref[...] = jnp.exp(0.5 * zlv)                                   # [K, tb]


def prepare_encoder_params(params):
    """One-time layout prep: [out, in] weights and [out, 1] biases (feature-major)."""
    t = lambda a: jnp.asarray(a, jnp.float32).T
    return dict(
        w1=t(params["w1"]), b1=t(params["b1"]),
        w2=t(params["w2"]), b2=t(params["b2"]),
        wmu=t(params["wmu"]), bmu=t(params["bmu"]),
        wlv=t(params["wlv"]), blv=t(params["blv"]),
    )


@functools.partial(jax.jit, static_argnames=("block_b",))
def encoder_forward(x, prep, block_b=None):
    B, S = x.shape
    H = prep["w1"].shape[0]
    K = prep["wmu"].shape[0]

    if block_b is None:
        # Step-overhead bound kernel: use fat batch tiles (per-step VMEM is tiny),
        # but keep >=2 grid steps for large B so both v7x TensorCores get work.
        block_b = max(128, min(4096, _round_up(pl.cdiv(B, 2), 128)))
    else:
        # Batch rides the lane axis -> tile must be a multiple of 128.
        block_b = max(128, _round_up(block_b, 128))

    Bp = _round_up(B, block_b)

    # Feature-major input [S, Bp].  The zero-pad fuses into the (required) transpose
    # pass, so x is read/written exactly once in HBM before the kernel starts.
    xT = jnp.pad(jnp.transpose(x.astype(jnp.float32)), ((0, 0), (0, Bp - B)))

    grid = (Bp // block_b,)

    # Grid-invariant full blocks for weights / biases.
    full = lambda shape: pl.BlockSpec(shape, lambda i: (0, 0))

    in_specs = [
        pl.BlockSpec((S, block_b), lambda i: (0, i)),   # x^T tile (pipelined over batch)
        full((H, S)), full((H, 1)),                     # fc1
        full((H, H)), full((H, 1)),                     # fc2
        full((K, H)), full((K, 1)),                     # fcmu
        full((K, H)), full((K, 1)),                     # fclv
    ]
    out_specs = [
        pl.BlockSpec((K, block_b), lambda i: (0, i)),   # loc^T   (lane-dense)
        pl.BlockSpec((K, block_b), lambda i: (0, i)),   # scale^T (lane-dense)
    ]
    out_shape = [
        jax.ShapeDtypeStruct((K, Bp), jnp.float32),
        jax.ShapeDtypeStruct((K, Bp), jnp.float32),
    ]

    locT, scaleT = pl.pallas_call(
        encoder_kernel,
        grid_spec=pltpu.PrefetchScalarGridSpec(
            num_scalar_prefetch=0,
            grid=grid,
            in_specs=in_specs,
            out_specs=out_specs,
        ),
        out_shape=out_shape,
        compiler_params=pltpu.CompilerParams(
            dimension_semantics=("parallel",),          # batch tiles shard across TCs (v7x)
        ),
    )(xT, prep["w1"], prep["b1"], prep["w2"], prep["b2"],
      prep["wmu"], prep["bmu"], prep["wlv"], prep["blv"])

    loc = locT[:, :B].T
    scale = scaleT[:, :B].T
    return loc, scale


def init_encoder_params(key, num_signals, num_states, hidden):
    """Deterministic init mimicking nn.Linear (uniform +/- 1/sqrt(fan_in)), [in, out]."""
    def linear(key, fan_in, fan_out):
        kw, kb = jax.random.split(key)
        bound = 1.0 / jnp.sqrt(fan_in)
        w = jax.random.uniform(kw, (fan_in, fan_out), jnp.float32, -bound, bound)
        b = jax.random.uniform(kb, (1, fan_out), jnp.float32, -bound, bound)
        return w, b

    k1, k2, k3, k4 = jax.random.split(key, 4)
    w1, b1 = linear(k1, num_signals, hidden)
    w2, b2 = linear(k2, hidden, hidden)
    wmu, bmu = linear(k3, hidden, num_states)
    wlv, blv = linear(k4, hidden, num_states)
    return dict(w1=w1, b1=b1, w2=w2, b2=b2, wmu=wmu, bmu=bmu, wlv=wlv, blv=blv)


def encoder_ref(x, p):
    """Pure-JAX (f32) reference for correctness checking (batch-major params)."""
    sp = lambda v: jnp.logaddexp(v, 0.0)
    h = sp(x @ p["w1"] + p["b1"])
    h = sp(h @ p["w2"] + p["b2"])
    loc = sp(h @ p["wmu"] + p["bmu"])
    lv = h @ p["wlv"] + p["blv"]
    return loc, jnp.exp(0.5 * lv)


if __name__ == "__main__":
    # Small, module-consistent shapes.
    batch = 300          # not a multiple of the batch tile -> exercises the padded tail
    num_signals = 8
    num_states = 4
    num_references = 3   # only affects the unused input_dim in the torch __init__
    hidden = 32

    key = jax.random.PRNGKey(0)
    kx, kp = jax.random.split(key)
    x = jax.random.normal(kx, (batch, num_signals), jnp.float32)
    params = init_encoder_params(kp, num_signals, num_states, hidden)
    prep = prepare_encoder_params(params)   # one-time layout prep (outside jit path)

    # Explicit small tile: grid=(3,), padded final tile, multi-step pipeline.
    loc, scale = encoder_forward(x, prep, block_b=128)
    jax.block_until_ready((loc, scale))

    # Default block_b heuristic path (grid=(2,) here).
    loc_d, scale_d = encoder_forward(x, prep)
    jax.block_until_ready((loc_d, scale_d))

    # Sanity check against pure-JAX f32 reference (all-f32 kernel -> tight tolerance).
    loc_ref, scale_ref = encoder_ref(x, params)
    tol = dict(atol=1e-5, rtol=1e-5)
    assert loc.shape == (batch, num_states) and scale.shape == (batch, num_states)
    assert jnp.allclose(loc, loc_ref, **tol)
    assert jnp.allclose(scale, scale_ref, **tol)
    assert jnp.allclose(loc_d, loc_ref, **tol)
    assert jnp.allclose(scale_d, scale_ref, **tol)

    print("KERNEL_OK")
</pallas_src>

<mosaic_0001>
module attributes {stable_mosaic.version = 11 : i64} {
  func.func @encoder_kernel(%arg0: i32, %arg1: memref<8x128xf32, #tpu.memory_space<vmem>>, %arg2: memref<32x8xf32, #tpu.memory_space<vmem>>, %arg3: memref<32x1xf32, #tpu.memory_space<vmem>>, %arg4: memref<32x32xf32, #tpu.memory_space<vmem>>, %arg5: memref<32x1xf32, #tpu.memory_space<vmem>>, %arg6: memref<4x32xf32, #tpu.memory_space<vmem>>, %arg7: memref<4x1xf32, #tpu.memory_space<vmem>>, %arg8: memref<4x32xf32, #tpu.memory_space<vmem>>, %arg9: memref<4x1xf32, #tpu.memory_space<vmem>>, %arg10: memref<4x128xf32, #tpu.memory_space<vmem>>, %arg11: memref<4x128xf32, #tpu.memory_space<vmem>>) attributes {dimension_semantics = [#tpu.dimension_semantics<parallel>], iteration_bounds = array<i64: 3>, scalar_prefetch = 0 : i64, scratch_operands = 0 : i64, tpu.core_type = #tpu.core_type<tc>, window_params = [{transform_indices = @transform_0, window_bounds = array<i64: 8, 128>}, {pipeline_mode = #tpu.pipeline_mode<synchronous>, transform_indices = @transform_1, window_bounds = array<i64: 32, 8>}, {pipeline_mode = #tpu.pipeline_mode<synchronous>, transform_indices = @transform_2, window_bounds = array<i64: 32, 1>}, {pipeline_mode = #tpu.pipeline_mode<synchronous>, transform_indices = @transform_3, window_bounds = array<i64: 32, 32>}, {pipeline_mode = #tpu.pipeline_mode<synchronous>, transform_indices = @transform_4, window_bounds = array<i64: 32, 1>}, {pipeline_mode = #tpu.pipeline_mode<synchronous>, transform_indices = @transform_5, window_bounds = array<i64: 4, 32>}, {pipeline_mode = #tpu.pipeline_mode<synchronous>, transform_indices = @transform_6, window_bounds = array<i64: 4, 1>}, {pipeline_mode = #tpu.pipeline_mode<synchronous>, transform_indices = @transform_7, window_bounds = array<i64: 4, 32>}, {pipeline_mode = #tpu.pipeline_mode<synchronous>, transform_indices = @transform_8, window_bounds = array<i64: 4, 1>}, {transform_indices = @transform_9, window_bounds = array<i64: 4, 128>}, {transform_indices = @transform_10, window_bounds = array<i64: 4, 128>}]} {
    %c0 = arith.constant 0 : index
    %c0_0 = arith.constant 0 : index
    %0 = vector.load %arg1[%c0, %c0_0] : memref<8x128xf32, #tpu.memory_space<vmem>>, vector<8x128xf32>
    %c0_1 = arith.constant 0 : index
    %c0_2 = arith.constant 0 : index
    %1 = vector.load %arg2[%c0_1, %c0_2] : memref<32x8xf32, #tpu.memory_space<vmem>>, vector<32x8xf32>
    %cst = arith.constant dense<0.000000e+00> : vector<32x128xf32>
    %2 = tpu.matmul %1, %0, %cst {dimension_numbers = #tpu.dot_dimension_numbers<[1], [0], [0], [1], [0, 0, 1, 1], [], []>} : vector<32x8xf32>, vector<8x128xf32>, vector<32x128xf32> -> vector<32x128xf32>
    %c0_3 = arith.constant 0 : index
    %c0_4 = arith.constant 0 : index
    %3 = vector.load %arg3[%c0_3, %c0_4] : memref<32x1xf32, #tpu.memory_space<vmem>>, vector<32x1xf32>
    %4 = vector.broadcast %3 : vector<32x1xf32> to vector<32x128xf32>
    %5 = arith.addf %2, %4 : vector<32x128xf32>
    %cst_5 = arith.constant 0.000000e+00 : f32
    %6 = vector.broadcast %cst_5 : f32 to vector<32x128xf32>
    %7 = arith.maximumf %5, %6 : vector<32x128xf32>
    %8 = vector.broadcast %cst_5 : f32 to vector<32x128xf32>
    %9 = arith.subf %5, %8 : vector<32x128xf32>
    %10 = arith.cmpf one, %9, %9 : vector<32x128xf32>
    %11 = vector.broadcast %cst_5 : f32 to vector<32x128xf32>
    %12 = arith.addf %5, %11 : vector<32x128xf32>
    %13 = math.absf %9 : vector<32x128xf32>
    %cst_6 = arith.constant 0.000000e+00 : f32
    %14 = vector.broadcast %cst_6 : f32 to vector<32x128xf32>
    %15 = arith.subf %14, %13 : vector<32x128xf32>
    %16 = math.exp %15 : vector<32x128xf32>
    %17 = math.log1p %16 : vector<32x128xf32>
    %18 = arith.addf %7, %17 : vector<32x128xf32>
    %19 = arith.select %10, %12, %18 : vector<32x128xi1>, vector<32x128xf32>
    %c0_7 = arith.constant 0 : index
    %c0_8 = arith.constant 0 : index
    %20 = vector.load %arg4[%c0_7, %c0_8] : memref<32x32xf32, #tpu.memory_space<vmem>>, vector<32x32xf32>
    %cst_9 = arith.constant dense<0.000000e+00> : vector<32x128xf32>
    %21 = tpu.matmul %20, %19, %cst_9 {dimension_numbers = #tpu.dot_dimension_numbers<[1], [0], [0], [1], [0, 0, 1, 1], [], []>} : vector<32x32xf32>, vector<32x128xf32>, vector<32x128xf32> -> vector<32x128xf32>
    %c0_10 = arith.constant 0 : index
    %c0_11 = arith.constant 0 : index
    %22 = vector.load %arg5[%c0_10, %c0_11] : memref<32x1xf32, #tpu.memory_space<vmem>>, vector<32x1xf32>
    %23 = vector.broadcast %22 : vector<32x1xf32> to vector<32x128xf32>
    %24 = arith.addf %21, %23 : vector<32x128xf32>
    %cst_12 = arith.constant 0.000000e+00 : f32
    %25 = vector.broadcast %cst_12 : f32 to vector<32x128xf32>
    %26 = arith.maximumf %24, %25 : vector<32x128xf32>
    %27 = vector.broadcast %cst_12 : f32 to vector<32x128xf32>
    %28 = arith.subf %24, %27 : vector<32x128xf32>
    %29 = arith.cmpf one, %28, %28 : vector<32x128xf32>
    %30 = vector.broadcast %cst_12 : f32 to vector<32x128xf32>
    %31 = arith.addf %24, %30 : vector<32x128xf32>
    %32 = math.absf %28 : vector<32x128xf32>
    %cst_13 = arith.constant 0.000000e+00 : f32
    %33 = vector.broadcast %cst_13 : f32 to vector<32x128xf32>
    %34 = arith.subf %33, %32 : vector<32x128xf32>
    %35 = math.exp %34 : vector<32x128xf32>
    %36 = math.log1p %35 : vector<32x128xf32>
    %37 = arith.addf %26, %36 : vector<32x128xf32>
    %38 = arith.select %29, %31, %37 : vector<32x128xi1>, vector<32x128xf32>
    %c0_14 = arith.constant 0 : index
    %c0_15 = arith.constant 0 : index
    %39 = vector.load %arg6[%c0_14, %c0_15] : memref<4x32xf32, #tpu.memory_space<vmem>>, vector<4x32xf32>
    %cst_16 = arith.constant dense<0.000000e+00> : vector<4x128xf32>
    %40 = tpu.matmul %39, %38, %cst_16 {dimension_numbers = #tpu.dot_dimension_numbers<[1], [0], [0], [1], [0, 0, 1, 1], [], []>} : vector<4x32xf32>, vector<32x128xf32>, vector<4x128xf32> -> vector<4x128xf32>
    %c0_17 = arith.constant 0 : index
    %c0_18 = arith.constant 0 : index
    %41 = vector.load %arg7[%c0_17, %c0_18] : memref<4x1xf32, #tpu.memory_space<vmem>>, vector<4x1xf32>
    %42 = vector.broadcast %41 : vector<4x1xf32> to vector<4x128xf32>
    %43 = arith.addf %40, %42 : vector<4x128xf32>
    %c0_19 = arith.constant 0 : index
    %c0_20 = arith.constant 0 : index
    %44 = vector.load %arg8[%c0_19, %c0_20] : memref<4x32xf32, #tpu.memory_space<vmem>>, vector<4x32xf32>
    %cst_21 = arith.constant dense<0.000000e+00> : vector<4x128xf32>
    %45 = tpu.matmul %44, %38, %cst_21 {dimension_numbers = #tpu.dot_dimension_numbers<[1], [0], [0], [1], [0, 0, 1, 1], [], []>} : vector<4x32xf32>, vector<32x128xf32>, vector<4x128xf32> -> vector<4x128xf32>
    %c0_22 = arith.constant 0 : index
    %c0_23 = arith.constant 0 : index
    %46 = vector.load %arg9[%c0_22, %c0_23] : memref<4x1xf32, #tpu.memory_space<vmem>>, vector<4x1xf32>
    %47 = vector.broadcast %46 : vector<4x1xf32> to vector<4x128xf32>
    %48 = arith.addf %45, %47 : vector<4x128xf32>
    %cst_24 = arith.constant 0.000000e+00 : f32
    %49 = vector.broadcast %cst_24 : f32 to vector<4x128xf32>
    %50 = arith.maximumf %43, %49 : vector<4x128xf32>
    %51 = vector.broadcast %cst_24 : f32 to vector<4x128xf32>
    %52 = arith.subf %43, %51 : vector<4x128xf32>
    %53 = arith.cmpf one, %52, %52 : vector<4x128xf32>
    %54 = vector.broadcast %cst_24 : f32 to vector<4x128xf32>
    %55 = arith.addf %43, %54 : vector<4x128xf32>
    %56 = math.absf %52 : vector<4x128xf32>
    %cst_25 = arith.constant 0.000000e+00 : f32
    %57 = vector.broadcast %cst_25 : f32 to vector<4x128xf32>
    %58 = arith.subf %57, %56 : vector<4x128xf32>
    %59 = math.exp %58 : vector<4x128xf32>
    %60 = math.log1p %59 : vector<4x128xf32>
    %61 = arith.addf %50, %60 : vector<4x128xf32>
    %62 = arith.select %53, %55, %61 : vector<4x128xi1>, vector<4x128xf32>
    %c0_26 = arith.constant 0 : index
    %c0_27 = arith.constant 0 : index
    %63 = vector.load %arg10[%c0_26, %c0_27] : memref<4x128xf32, #tpu.memory_space<vmem>>, vector<4x128xf32>
    tpu.vector_store %arg10[%c0_26, %c0_27], %62 {strides = array<i32>} : memref<4x128xf32, #tpu.memory_space<vmem>>, vector<4x128xf32>,
    %cst_28 = arith.constant 5.000000e-01 : f32
    %64 = vector.broadcast %cst_28 : f32 to vector<4x128xf32>
    %65 = arith.mulf %64, %48 : vector<4x128xf32>
    %66 = math.exp %65 : vector<4x128xf32>
    %c0_29 = arith.constant 0 : index
    %c0_30 = arith.constant 0 : index
    %67 = vector.load %arg11[%c0_29, %c0_30] : memref<4x128xf32, #tpu.memory_space<vmem>>, vector<4x128xf32>
    tpu.vector_store %arg11[%c0_29, %c0_30], %66 {strides = array<i32>} : memref<4x128xf32, #tpu.memory_space<vmem>>, vector<4x128xf32>,
    return
  }
  func.func @transform_0(%arg0: i32) -> (i32, i32) {
    %c0_i32 = arith.constant 0 : i32
    %c0_i32_0 = arith.constant 0 : i32
    return %c0_i32, %arg0 : i32, i32
  }
  func.func @transform_1(%arg0: i32) -> (i32, i32) {
    %c0_i32 = arith.constant 0 : i32
    %c0_i32_0 = arith.constant 0 : i32
    %c0_i32_1 = arith.constant 0 : i32
    return %c0_i32, %c0_i32_0 : i32, i32
  }
  func.func @transform_2(%arg0: i32) -> (i32, i32) {
    %c0_i32 = arith.constant 0 : i32
    %c0_i32_0 = arith.constant 0 : i32
    %c0_i32_1 = arith.constant 0 : i32
    return %c0_i32, %c0_i32_0 : i32, i32
  }
  func.func @transform_3(%arg0: i32) -> (i32, i32) {
    %c0_i32 = arith.constant 0 : i32
    %c0_i32_0 = arith.constant 0 : i32
    %c0_i32_1 = arith.constant 0 : i32
    return %c0_i32, %c0_i32_0 : i32, i32
  }
  func.func @transform_4(%arg0: i32) -> (i32, i32) {
    %c0_i32 = arith.constant 0 : i32
    %c0_i32_0 = arith.constant 0 : i32
    %c0_i32_1 = arith.constant 0 : i32
    return %c0_i32, %c0_i32_0 : i32, i32
  }
  func.func @transform_5(%arg0: i32) -> (i32, i32) {
    %c0_i32 = arith.constant 0 : i32
    %c0_i32_0 = arith.constant 0 : i32
    %c0_i32_1 = arith.constant 0 : i32
    return %c0_i32, %c0_i32_0 : i32, i32
  }
  func.func @transform_6(%arg0: i32) -> (i32, i32) {
    %c0_i32 = arith.constant 0 : i32
    %c0_i32_0 = arith.constant 0 : i32
    %c0_i32_1 = arith.constant 0 : i32
    return %c0_i32, %c0_i32_0 : i32, i32
  }
  func.func @transform_7(%arg0: i32) -> (i32, i32) {
    %c0_i32 = arith.constant 0 : i32
    %c0_i32_0 = arith.constant 0 : i32
    %c0_i32_1 = arith.constant 0 : i32
    return %c0_i32, %c0_i32_0 : i32, i32
  }
  func.func @transform_8(%arg0: i32) -> (i32, i32) {
    %c0_i32 = arith.constant 0 : i32
    %c0_i32_0 = arith.constant 0 : i32
    %c0_i32_1 = arith.constant 0 : i32
    return %c0_i32, %c0_i32_0 : i32, i32
  }
  func.func @transform_9(%arg0: i32) -> (i32, i32) {
    %c0_i32 = arith.constant 0 : i32
    %c0_i32_0 = arith.constant 0 : i32
    return %c0_i32, %arg0 : i32, i32
  }
  func.func @transform_10(%arg0: i32) -> (i32, i32) {
    %c0_i32 = arith.constant 0 : i32
    %c0_i32_0 = arith.constant 0 : i32
    return %c0_i32, %arg0 : i32, i32
  }
}

</mosaic_0001>

<bundles_post_ra>
// kernel: encoder_forward.1
= control target key start
LH: loop header
LB: loop body
LE: loop exit
PB: predicated region body
PF: predicated region fallthrough
CT: control target
= control target key end

     0   :  { %s1256_s13 = smov 0   ;;  %s1410_s0 = inlined_call_operand.vmem [shape: f32[8,384], index: 0, kind: input, shape index: {}]   ;;  %s1411_s1 = inlined_call_operand.vmem [shape: f32[32,8], index: 1, kind: input, shape index: {}]   ;;  %s1412_s2 = inlined_call_operand.vmem [shape: f32[32,1], index: 2, kind: input, shape index: {}]   ;;  %s1413_s3 = inlined_call_operand.vmem [shape: f32[32,32], index: 3, kind: input, shape index: {}]   ;;  %s1414_s4 = inlined_call_operand.vmem [shape: f32[32,1], index: 4, kind: input, shape index: {}]   ;;  %s1415_s5 = inlined_call_operand.vmem [shape: f32[4,32], index: 5, kind: input, shape index: {}]   ;;  %s1416_s6 = inlined_call_operand.vmem [shape: f32[4,1], index: 6, kind: input, shape index: {}]   ;;  %s1417_s7 = inlined_call_operand.vmem [shape: f32[4,32], index: 7, kind: input, shape index: {}]   ;;  %s1418_s8 = inlined_call_operand.vmem [shape: f32[4,1], index: 8, kind: input, shape index: {}]   ;;  %s1419_s9 = inlined_call_operand.vmem [shape: f32[4,384], index: 9, kind: output, shape index: {0}]   ;;  %s1420_s10 = inlined_call_operand.vmem [shape: f32[4,384], index: 10, kind: output, shape index: {1}]  }
   0x1 LB: > { %s1030_s14 = sadd.s32 4294967295, %s1195_s13   ;;  %p1034_p0 = scmp.ge.s32.totalorder %s1195_s13, 1  ;;  %s1195_s13 = sphi %s1256_s13, %s21_s13  }
   0x2   : > { %p314_p1 = scmp.lt.s32.totalorder %s1195_s13, 4 }
   0x4   : > { %p315_p2 = pnand %p1034_p0, %p314_p1 }
   0x5   : > { %p354_p3 = scmp.lt.s32.totalorder (!%p315_p2), %s1030_s14, 2  ;;  %v367_v0 = vld [vmem:[%s1411_s1] sm:$0xff] (!%p315_p2)  ;;  %vm395_vm0 = vcmask (!%p315_p2), 64512   ;;  %v1197_v1 = vmov (!%p315_p2), 0   ;;  %v373_v3 = vld [vmem:[%s1412_s2 + $0x10] sm:$0xff] (!%p315_p2)  ;;  %v372_v4 = vld [vmem:[%s1412_s2 + $0x8] sm:$0xff] (!%p315_p2) }
   0x6   : > { %318 = sbr.rel (%p315_p2) target bundleno = 791 (0x317), region = 56  ;;  %1075 = vmatprep.mubr.msk.f32.mxu0 (!%p315_p2), %vm395_vm0, %v367_v0  ;;  %1149 = vset.pattern.permute.xlu0 (!%p315_p2), %v1197_v1  ;;  %v371_v2 = vld [vmem:[%s1412_s2] sm:$0xff] (!%p315_p2)  ;;  %v374_v5 = vld [vmem:[%s1412_s2 + $0x18] sm:$0xff] (!%p315_p2)  ;;  %v368_v7 = vld [vmem:[%s1411_s1 + $0x8] sm:$0xff] (!%p315_p2)  ;;  %vm593_vm1 = vcmask (!%p315_p2), 261120   ;;  %vm1199_vm10 = vmmov (!%p315_p2), 0  }
   0x7   : > { %377 = vperm.xlu0 (!%p315_p2), %1149, %v371_v2   ;;  %1150 = vset.pattern.permute.xlu1 (!%p315_p2), %v1197_v1  ;;  %v369_v8 = vld [vmem:[%s1411_s1 + $0x10] sm:$0xff] (!%p315_p2)  ;;  %v569_v9 = vld [vmem:[%s1414_s4] sm:$0xff] (!%p315_p2)  ;;  %v570_v10 = vld [vmem:[%s1414_s4 + $0x8] sm:$0xff] (!%p315_p2) }
   0x8   : > { %387 = vperm.xlu1 (!%p315_p2), %1150, %v373_v3   ;;  %v370_v11 = vld [vmem:[%s1411_s1 + $0x18] sm:$0xff] (!%p315_p2)  ;;  %v571_v12 = vld [vmem:[%s1414_s4 + $0x10] sm:$0xff] (!%p315_p2)  ;;  %v764_v14 = vld [vmem:[%s1416_s6] sm:$0xf] (!%p315_p2) }
   0x9   : > { %v572_v13 = vld [vmem:[%s1414_s4 + $0x18] sm:$0xff] (!%p315_p2)  ;;  %v844_v15 = vld [vmem:[%s1418_s8] sm:$0xf] (!%p315_p2) }
   0xa   : > { %v565_v16 = vld [vmem:[%s1413_s3] sm:$0xff] (!%p315_p2) }
   0xb   : > { %382 = vperm.xlu0 (!%p315_p2), %1149, %v372_v4   ;;  %1089 = vmatprep.mubr.msk.f32.mxu1 (!%p315_p2), %vm593_vm1, %v565_v16 }
   0xc   : > { %392 = vperm.xlu1 (!%p315_p2), %1150, %v374_v5  }
   0xd   : > { %s1422_s14 = smov (!%p354_p3, %s1030_s14), 2 }
   0xe   : > { %s1035_s23 = sshll.u32 %s1422_s14, 3 }
   0xf   : > { %s357_s28 = scalar_lea.vmem %s1410_s0, %s1035_s23  ;;  %575 = vperm.xlu0 %1149, %v569_v9   ;;  %s1036_s23 = sshll.u32 %s1422_s14, 2 }
  0x10   : > { %v366_v6 = vld [vmem:[%s357_s28] sm:$0xff]  ;;  %580 = vperm.xlu1 %1150, %v570_v10   ;;  %s365_s26 = scalar_lea.vmem %s1420_s10, %s1036_s23  ;;  %s361_s28 = scalar_lea.vmem %s1419_s9, %s1036_s23 }
  0x11   : > { %1073 = vmatprep.subr.mxu0 %v366_v6 }
  0x12   : > { %1074 = vmatpush3.msra.mxu0 %v366_v6 }
  0x13   : > { %1076 = vmatmul.mubr.msk.f32.vlgmr.msra.gmra.mrb[0].mxu0 %vm395_vm0, %v368_v7  ;;  %585 = vperm.xlu0 %1149, %v571_v12  }
  0x14   : > { %1078 = vmatprep.mubr.msk.f32.mxu0 %vm395_vm0, %v369_v8  ;;  %590 = vperm.xlu1 %1150, %v572_v13  }
  0x17   : > { %1079 = vmatmul.mubr.msk.f32.gmra.mrb[2].mxu0 %vm395_vm0, %v370_v11  ;;  %767 = vperm.xlu0 %1149, %v764_v14  }
  0x18   : > { %847 = vperm.xlu1 %1150, %v844_v15  }
  0x86   : > { %v378_v17 = vpop.permute.xlu0 %377 }
  0x87   : > { %v388_v18 = vpop.permute.xlu1 %387 }
  0x8a   : > { %v383_v19 = vpop.permute.xlu0 %382 }
  0x8b   : > { %v393_v25 = vpop.permute.xlu1 %392 }
  0xe6   : > { %v1077_v20 = vpop.f32.mrb[0].mxu0 }
  0xe7   : > { %v1320_v21 = vadd.f32 %v1077_v20, %v383_v19  ;;  %v474_v22 = vpop.f32.mrb[1].mxu0 }
  0xe8   : > { %v1322_v23 = vadd.f32 %v474_v22, %v378_v17 }
  0xe9   : > { %v506_v24 = vand.u32 2147483647, %v1320_v21  ;;  %v494_v58 = vmax.f32 %v1320_v21, 0.0  ;;  %vm498_vm5 = vcmp.ne.f32.partialorder %v1320_v21, %v1320_v21 }
  0xea   : > { %v505_v26 = vand.u32 2147483647, %v1322_v23  ;;  %v1080_v27 = vpop.f32.mrb[2].mxu0  ;;  %v493_v3 = vmax.f32 %v1322_v23, 0.0  ;;  %vm497_vm4 = vcmp.ne.f32.partialorder %v1322_v23, %v1322_v23 }
  0xeb   : > { %v510_v28 = vsub.f32 0.0, %v506_v24  ;;  %v1326_v29 = vadd.f32 %v1080_v27, %v393_v25  ;;  %v484_v30 = vpop.f32.mrb[3].mxu0 }
  0xec   : > { %v509_v31 = vsub.f32 0.0, %v505_v26  ;;  %v1328_v32 = vadd.f32 %v484_v30, %v388_v18  ;;  %v1198_v30 = vmov 0.0|0.0  }
  0xed   : > { %v515_v33 = vmul.f32 1.442695, %v510_v28  ;;  %v508_v34 = vand.u32 2147483647, %v1326_v29  ;;  %v496_v10 = vmax.f32 %v1326_v29, 0.0  ;;  %vm500_vm8 = vcmp.ne.f32.partialorder %v1326_v29, %v1326_v29  ;;  %v567_v28 = vld [vmem:[%s1413_s3 + $0x10] sm:$0xff]  ;;  %1125 = vmatprep.subr.bf16.mxu0 %v1198_v30 }
  0xee   : > { %v513_v35 = vmul.f32 1.442695, %v509_v31  ;;  %v507_v36 = vand.u32 2147483647, %v1328_v32  ;;  %v495_v17 = vmax.f32 %v1328_v32, 0.0  ;;  %vm499_vm9 = vcmp.ne.f32.partialorder %v1328_v32, %v1328_v32 }
  0xef   : > { %1151 = vpow2.f32 %v515_v33  ;;  %v512_v37 = vsub.f32 0.0, %v508_v34  ;;  %v1200_v31 = vmov 0.0   ;;  %v576_v33 = vpop.permute.xlu0 %575 }
  0xf0   : > { %1153 = vpow2.f32 %v513_v35  ;;  %v511_v38 = vsub.f32 0.0, %v507_v36  ;;  %1103 = vmatprep.mubr.msk.f32.mxu0 %vm1199_vm10, %v1200_v31 }
  0xf1   : > { %v519_v39 = vmul.f32 1.442695, %v512_v37 }
  0xf2   : > { %v517_v40 = vmul.f32 1.442695, %v511_v38 }
  0xf3   : > { %1155 = vpow2.f32 %v519_v39 }
  0xf4   : > { %1157 = vpow2.f32 %v517_v40 }
  0xf9   : > { %v1152_v41 = vpop.eup %1151 }
  0xfa   : > { %v1154_v42 = vpop.eup %1153  ;;  %v530_v43 = vadd.f32 1.0, %v1152_v41  ;;  %v533_v48 = vmul.f32 -0.5, %v1152_v41  ;;  %v536_v52 = vand.u32 2147483647, %v1152_v41 }
  0xfb   : > { %v521_v44 = vadd.f32 1.0, %v1154_v42  ;;  %v524_v50 = vmul.f32 -0.5, %v1154_v42  ;;  %v527_v56 = vand.u32 2147483647, %v1154_v42 }
  0xfc   : > { %1159 = vlog2.f32 %v530_v43  ;;  %v534_v51 = vadd.f32 1.0, %v533_v48  ;;  %vm537_vm2 = vcmp.lt.f32.partialorder %v536_v52, 0.0004427343 }
  0xfd   : > { %v1156_v45 = vpop.eup %1155  ;;  %1161 = vlog2.f32 %v521_v44  ;;  %v525_v54 = vadd.f32 1.0, %v524_v50  ;;  %vm528_vm3 = vcmp.lt.f32.partialorder %v527_v56, 0.0004427343 }
  0xfe   : > { %v1158_v46 = vpop.eup %1157  ;;  %v548_v47 = vadd.f32 1.0, %v1156_v45  ;;  %v551_v53 = vmul.f32 -0.5, %v1156_v45  ;;  %v535_v61 = vmul.f32 %v1152_v41, %v534_v51  ;;  %v554_v2 = vand.u32 2147483647, %v1156_v45 }
  0xff   : > { %v539_v49 = vadd.f32 1.0, %v1158_v46  ;;  %v542_v55 = vmul.f32 -0.5, %v1158_v46  ;;  %v526_v0 = vmul.f32 %v1154_v42, %v525_v54  ;;  %v545_v5 = vand.u32 2147483647, %v1158_v46  ;;  %v586_v42 = vpop.permute.xlu0 %585 }
 0x100   : > { %1163 = vlog2.f32 %v548_v47  ;;  %v552_v62 = vadd.f32 1.0, %v551_v53  ;;  %vm555_vm6 = vcmp.lt.f32.partialorder %v554_v2, 0.0004427343 }
 0x101   : > { %1165 = vlog2.f32 %v539_v49  ;;  %v543_v1 = vadd.f32 1.0, %v542_v55  ;;  %vm546_vm7 = vcmp.lt.f32.partialorder %v545_v5, 0.0004427343 }
 0x102   : > { %v553_v13 = vmul.f32 %v1156_v45, %v552_v62 }
 0x103   : > { %v544_v16 = vmul.f32 %v1158_v46, %v543_v1 }
 0x106   : > { %v1160_v57 = vpop.eup %1159 }
 0x107   : > { %v1162_v59 = vpop.eup %1161  ;;  %v532_v60 = vmul.f32 0.6931472, %v1160_v57 }
 0x108   : > { %v523_v63 = vmul.f32 0.6931472, %v1162_v59 }
 0x109   : > { %v538_v4 = vsel %vm537_vm2, %v535_v61, %v532_v60 }
 0x10a   : > { %v1164_v6 = vpop.eup %1163  ;;  %v529_v7 = vsel %vm528_vm3, %v526_v0, %v523_v63  ;;  %v558_v8 = vadd.f32 %v538_v4, %v494_v58 }
 0x10b   : > { %v1166_v9 = vpop.eup %1165  ;;  %v557_v11 = vadd.f32 %v529_v7, %v493_v3  ;;  %v550_v12 = vmul.f32 0.6931472, %v1164_v6 }
 0x10c   : > { %v562_v14 = vsel %vm498_vm5, %v1320_v21, %v558_v8  ;;  %v541_v15 = vmul.f32 0.6931472, %v1166_v9 }
 0x10d   : > { %v561_v18 = vsel %vm497_vm4, %v1322_v23, %v557_v11  ;;  %v556_v19 = vsel %vm555_vm6, %v553_v13, %v550_v12  ;;  %v566_v23 = vld [vmem:[%s1413_s3 + $0x8] sm:$0xff] }
 0x10e   : > { %v1117_v20 = vpack.c.bf16 %v562_v14, %v561_v18  ;;  %v547_v22 = vsel %vm546_vm7, %v544_v16, %v541_v15  ;;  %v560_v24 = vadd.f32 %v556_v19, %v496_v10 }
 0x10f   : > { %v559_v25 = vadd.f32 %v547_v22, %v495_v17 }
 0x110   : > { %1118 = vmatprep.subr.bf16.mxu1 %v1117_v20  ;;  %v564_v21 = vsel %vm500_vm8, %v1326_v29, %v560_v24  ;;  %v568_v29 = vld [vmem:[%s1413_s3 + $0x18] sm:$0xff] }
 0x111   : > { %1120 = vmatpush3.bf16.msra.mxu1 %v1117_v20  ;;  %v563_v26 = vsel %vm499_vm9, %v1328_v32, %v559_v25  ;;  %v581_v32 = vpop.permute.xlu1 %580 }
 0x112   : > { %v1121_v27 = vpack.c.bf16 %v564_v21, %v563_v26 }
 0x114   : > { %1122 = vmatprep.subr.bf16.mxu1 %v1121_v27 }
 0x115   : > { %1124 = vmatpush3.bf16.msra.mxu1 %v1121_v27  ;;  %v591_v39 = vpop.permute.xlu1 %590 }
 0x116   : > { %1131 = vmatprep.subr.bf16.mxu1 %v1198_v30 }
 0x118   : > { %1090 = vmatmul.mubr.msk.f32.vlgmr.msra.gmra.mrb[0].mxu1 %vm593_vm1, %v566_v23 }
 0x119   : > { %1092 = vmatprep.mubr.msk.f32.mxu1 %vm593_vm1, %v567_v28 }
 0x11c   : > { %1093 = vmatmul.mubr.msk.f32.gmra.mrb[2].mxu1 %vm593_vm1, %v568_v29 }
 0x11d   : > { %1114 = vmatprep.mubr.msk.f32.mxu1 %vm1199_vm10, %v1200_v31 }
 0x1eb   : > { %v1091_v34 = vpop.f32.mrb[0].mxu1 }
 0x1ec   : > { %v1362_v35 = vadd.f32 %v1091_v34, %v581_v32  ;;  %v672_v36 = vpop.f32.mrb[1].mxu1 }
 0x1ed   : > { %v1364_v37 = vadd.f32 %v672_v36, %v576_v33 }
 0x1ee   : > { %v704_v38 = vand.u32 2147483647, %v1362_v35  ;;  %v692_v9 = vmax.f32 %v1362_v35, 0.0  ;;  %vm696_vm13 = vcmp.ne.f32.partialorder %v1362_v35, %v1362_v35 }
 0x1ef   : > { %v703_v40 = vand.u32 2147483647, %v1364_v37  ;;  %v1094_v41 = vpop.f32.mrb[2].mxu1  ;;  %v691_v19 = vmax.f32 %v1364_v37, 0.0  ;;  %vm695_vm14 = vcmp.ne.f32.partialorder %v1364_v37, %v1364_v37 }
 0x1f0   : > { %v708_v43 = vsub.f32 0.0, %v704_v38  ;;  %v1368_v44 = vadd.f32 %v1094_v41, %v591_v39  ;;  %v682_v45 = vpop.f32.mrb[3].mxu1 }
 0x1f1   : > { %v707_v46 = vsub.f32 0.0, %v703_v40  ;;  %v1370_v47 = vadd.f32 %v682_v45, %v586_v42  ;;  %v843_v45 = vld [vmem:[%s1417_s7] sm:$0xf] }
 0x1f2   : > { %v713_v48 = vmul.f32 1.442695, %v708_v43  ;;  %v706_v49 = vand.u32 2147483647, %v1368_v44  ;;  %v694_v27 = vmax.f32 %v1368_v44, 0.0  ;;  %vm698_vm2 = vcmp.ne.f32.partialorder %v1368_v44, %v1368_v44 }
 0x1f3   : > { %v711_v50 = vmul.f32 1.442695, %v707_v46  ;;  %v705_v51 = vand.u32 2147483647, %v1370_v47  ;;  %v693_v34 = vmax.f32 %v1370_v47, 0.0  ;;  %vm697_vm3 = vcmp.ne.f32.partialorder %v1370_v47, %v1370_v47 }
 0x1f4   : > { %1167 = vpow2.f32 %v713_v48  ;;  %v710_v52 = vsub.f32 0.0, %v706_v49  ;;  %v763_v43 = vld [vmem:[%s1415_s5] sm:$0xf] }
 0x1f5   : > { %1169 = vpow2.f32 %v711_v50  ;;  %v709_v53 = vsub.f32 0.0, %v705_v51 }
 0x1f6   : > { %v717_v54 = vmul.f32 1.442695, %v710_v52 }
 0x1f7   : > { %v715_v55 = vmul.f32 1.442695, %v709_v53 }
 0x1f8   : > { %1171 = vpow2.f32 %v717_v54 }
 0x1f9   : > { %1173 = vpow2.f32 %v715_v55 }
 0x1fe   : > { %v1168_v56 = vpop.eup %1167 }
 0x1ff   : > { %v1170_v57 = vpop.eup %1169  ;;  %v728_v58 = vadd.f32 1.0, %v1168_v56  ;;  %v731_v63 = vmul.f32 -0.5, %v1168_v56  ;;  %v734_v3 = vand.u32 2147483647, %v1168_v56 }
 0x200   : > { %v719_v59 = vadd.f32 1.0, %v1170_v57  ;;  %v722_v1 = vmul.f32 -0.5, %v1170_v57  ;;  %v725_v7 = vand.u32 2147483647, %v1170_v57 }
 0x201   : > { %1175 = vlog2.f32 %v728_v58  ;;  %v732_v2 = vadd.f32 1.0, %v731_v63  ;;  %vm735_vm11 = vcmp.lt.f32.partialorder %v734_v3, 0.0004427343 }
 0x202   : > { %v1172_v60 = vpop.eup %1171  ;;  %1177 = vlog2.f32 %v719_v59  ;;  %v723_v5 = vadd.f32 1.0, %v722_v1  ;;  %vm726_vm12 = vcmp.lt.f32.partialorder %v725_v7, 0.0004427343 }
 0x203   : > { %v1174_v61 = vpop.eup %1173  ;;  %v746_v62 = vadd.f32 1.0, %v1172_v60  ;;  %v749_v4 = vmul.f32 -0.5, %v1172_v60  ;;  %v733_v12 = vmul.f32 %v1168_v56, %v732_v2  ;;  %v752_v16 = vand.u32 2147483647, %v1172_v60 }
 0x204   : > { %v737_v0 = vadd.f32 1.0, %v1174_v61  ;;  %v740_v6 = vmul.f32 -0.5, %v1174_v61  ;;  %v724_v15 = vmul.f32 %v1170_v57, %v723_v5  ;;  %v743_v20 = vand.u32 2147483647, %v1174_v61 }
 0x205   : > { %1179 = vlog2.f32 %v746_v62  ;;  %v750_v13 = vadd.f32 1.0, %v749_v4  ;;  %vm753_vm15 = vcmp.lt.f32.partialorder %v752_v16, 0.0004427343 }
 0x206   : > { %1181 = vlog2.f32 %v737_v0  ;;  %v741_v17 = vadd.f32 1.0, %v740_v6  ;;  %vm744_vm0 = vcmp.lt.f32.partialorder %v743_v20, 0.0004427343 }
 0x207   : > { %v751_v28 = vmul.f32 %v1172_v60, %v750_v13 }
 0x208   : > { %v742_v31 = vmul.f32 %v1174_v61, %v741_v17 }
 0x20b   : > { %v1176_v8 = vpop.eup %1175 }
 0x20c   : > { %v1178_v10 = vpop.eup %1177  ;;  %v730_v11 = vmul.f32 0.6931472, %v1176_v8 }
 0x20d   : > { %v721_v14 = vmul.f32 0.6931472, %v1178_v10 }
 0x20e   : > { %v736_v18 = vsel %vm735_vm11, %v733_v12, %v730_v11 }
 0x20f   : > { %v1180_v22 = vpop.eup %1179  ;;  %v756_v24 = vadd.f32 %v736_v18, %v692_v9  ;;  %v727_v25 = vsel %vm726_vm12, %v724_v15, %v721_v14 }
 0x210   : > { %v1182_v21 = vpop.eup %1181  ;;  %v755_v26 = vadd.f32 %v727_v25, %v691_v19  ;;  %v748_v23 = vmul.f32 0.6931472, %v1180_v22 }
 0x211   : > { %v739_v29 = vmul.f32 0.6931472, %v1182_v21  ;;  %v760_v32 = vsel %vm696_vm13, %v1362_v35, %v756_v24 }
 0x212   : > { %v754_v33 = vsel %vm753_vm15, %v751_v28, %v748_v23  ;;  %v759_v36 = vsel %vm695_vm14, %v1364_v37, %v755_v26 }
 0x213   : > { %v758_v38 = vadd.f32 %v754_v33, %v694_v27  ;;  %v745_v39 = vsel %vm744_vm0, %v742_v31, %v739_v29  ;;  %v1126_v40 = vpack.c.bf16 %v760_v32, %v759_v36 }
 0x214   : > { %v757_v41 = vadd.f32 %v745_v39, %v693_v34 }
 0x215   : > { %1127 = vmatpush3.bf16.msra.mxu0 %v1126_v40  ;;  %1133 = vmatpush3.bf16.msra.mxu1 %v1126_v40  ;;  %v762_v35 = vsel %vm698_vm2, %v1368_v44, %v758_v38  ;;  %v768_v44 = vpop.permute.xlu0 %767 }
 0x216   : > { %1128 = vmatprep.subr.bf16.mxu0 %v1198_v30  ;;  %1134 = vmatprep.subr.bf16.mxu1 %v1198_v30  ;;  %v761_v37 = vsel %vm697_vm3, %v1370_v47, %v757_v41  ;;  %v848_v30 = vpop.permute.xlu1 %847 }
 0x217   : > { %v1129_v42 = vpack.c.bf16 %v762_v35, %v761_v37 }
 0x219   : > { %1130 = vmatpush3.bf16.msra.mxu0 %v1129_v42  ;;  %1136 = vmatpush3.bf16.msra.mxu1 %v1129_v42 }
 0x21c   : > { %1104 = vmatmul.mubr.msk.f32.vlgmr.msra.gmra.mrb[4].mxu0 %vm593_vm1, %v763_v43  ;;  %1115 = vmatmul.mubr.msk.f32.vlgmr.msra.gmra.mrb[4].mxu1 %vm593_vm1, %v843_v45 }
 0x2ef   : > { %v839_v46 = vpop.f32.mrb[4].mxu0  ;;  %v919_v47 = vpop.f32.mrb[4].mxu1 }
 0x2f0   : > { %v840_v48 = vadd.f32 %v839_v46, %v768_v44  ;;  %v920_v49 = vadd.f32 %v919_v47, %v848_v30  ;;  %v1105_v50 = vpop.f32.mrb[5].mxu0  ;;  %v1116_v51 = vpop.f32.mrb[5].mxu1 }
 0x2f2   : > { %v926_v52 = vand.u32 2147483647, %v840_v48  ;;  %v942_v53 = vmul.f32 0.5, %v920_v49  ;;  %v923_v2 = vmax.f32 %v840_v48, 0.0  ;;  %vm924_vm4 = vcmp.ne.f32.partialorder %v840_v48, %v840_v48 }
 0x2f4   : > { %v927_v54 = vsub.f32 0.0, %v926_v52  ;;  %v943_v55 = vmul.f32 1.442695, %v942_v53 }
 0x2f6   : > { %v928_v56 = vmul.f32 1.442695, %v927_v54  ;;  %1183 = vpow2.f32 %v943_v55 }
 0x2f8   : > { %1185 = vpow2.f32 %v928_v56 }
 0x300   : > { %v1184_v57 = vpop.eup %1183 }
 0x301   : > { %945 = vst [vmem:[%s365_s26] sm:$0xf] %v1184_v57 }
 0x302   : > { %v1186_v58 = vpop.eup %1185 }
 0x303   : > { %v930_v59 = vadd.f32 1.0, %v1186_v58  ;;  %v933_v60 = vmul.f32 -0.5, %v1186_v58  ;;  %v936_v62 = vand.u32 2147483647, %v1186_v58 }
 0x305   : > { %1187 = vlog2.f32 %v930_v59  ;;  %v934_v61 = vadd.f32 1.0, %v933_v60  ;;  %vm937_vm1 = vcmp.lt.f32.partialorder %v936_v62, 0.0004427343 }
 0x307   : > { %v935_v1 = vmul.f32 %v1186_v58, %v934_v61 }
 0x30f   : > { %v1188_v63 = vpop.eup %1187 }
 0x310   : > { %v932_v0 = vmul.f32 0.6931472, %v1188_v63 }
 0x312   : > { %v938_v3 = vsel %vm937_vm1, %v935_v1, %v932_v0 }
 0x313   : > { %v939_v4 = vadd.f32 %v938_v3, %v923_v2 }
 0x315   : > { %v940_v5 = vsel %vm924_vm4, %v840_v48, %v939_v4 }
 0x316   : > { %941 = vst [vmem:[%s361_s28] sm:$0xf] %v940_v5 }
 0x317 PF: > { %s21_s13 = sadd.s32 1, %s1195_s13  }
 0x318   : > { %p18_p4 = scmp.ge.s32.totalorder %s21_s13, 5  }
 0x31a   :  { %20 = sbr.rel (!%p18_p4) target bundleno = 1 (0x1), region = 98 }

</bundles_post_ra>
